<compile_context>
chip_gen: v7x
topology: tpu7x:2x2x1
jax: 0.10.0
libtpu: 0.0.40
codegen_flags: <defaults>
</compile_context>

<pallas_src>
import jax
import jax.numpy as jnp
from jax import lax
from jax.experimental import pallas as pl


# Contract the LAST dim of both operands: a (B, K) . w (H, K) -> (B, H),
# i.e. a @ w.T without ever materializing a transpose (weights keep the
# original PyTorch row layout, no extra HBM round trip).
_CONTRACT_LAST = (((1,), (1,)), ((), ()))


def _full_spec(shape):
    # Grid-less call: one invocation over the whole (tiny) array, resident in VMEM.
    return pl.BlockSpec(shape, lambda: (0,) * len(shape))


def prepare_bias(b_ih, b_hh):
    """One-time bias fusion (init-time analogue of nn.RNNCell setup)."""
    return (b_ih + b_hh).reshape(1, -1)                      # (1, H)


# ----------------------------------------------------------------------------
# Single RNNCell step (matches Model.forward exactly).
# ----------------------------------------------------------------------------
def rnncell_step_kernel(x_ref, h_ref, w_ih_ref, w_hh_ref, b_ref, out_ref):
    # x:(B,I)  h:(B,H)  w_ih:(H,I)  w_hh:(H,H)  b:(1,H)  out:(B,H)
    pre = lax.dot_general(x_ref[...], w_ih_ref[...], _CONTRACT_LAST,
                          preferred_element_type=jnp.float32)
    pre += lax.dot_general(h_ref[...], w_hh_ref[...], _CONTRACT_LAST,
                           preferred_element_type=jnp.float32)
    out_ref[...] = jnp.tanh(pre + b_ref[...]).astype(out_ref.dtype)


def rnncell_forward(x, h, w_ih, w_hh, b_fused):
    """One RNNCell step.  Do NOT call this per-timestep in a Python loop over a
    sequence -- use rnn_sequence_forward (weights DMA'd once, no re-dispatch)."""
    B, I = x.shape
    H = h.shape[1]
    return pl.pallas_call(
        rnncell_step_kernel,
        out_shape=jax.ShapeDtypeStruct((B, H), x.dtype),
        in_specs=[_full_spec((B, I)), _full_spec((B, H)),
                  _full_spec((H, I)), _full_spec((H, H)), _full_spec((1, H))],
        out_specs=_full_spec((B, H)),
    )(x, h, w_ih, w_hh, b_fused)


# ----------------------------------------------------------------------------
# Whole sequence: recurrence-only kernel, ONE grid-less pallas_call.
# ----------------------------------------------------------------------------
def rnn_recurrence_kernel(xproj_ref, h0_ref, w_hh_ref, hs_ref):
    # xproj:(T,B,H) = xs @ W_ih^T + b_ih + b_hh  (precomputed, off the serial path)
    # h0:(B,H)  w_hh:(H,H)  hs:(T,B,H) hidden state after every step.
    T = xproj_ref.shape[0]

    def step(t, h):
        # Serial critical path per step: one small matmul + tanh, nothing else.
        pre = xproj_ref[t] + lax.dot_general(h, w_hh_ref[...], _CONTRACT_LAST,
                                             preferred_element_type=jnp.float32)
        h_new = jnp.tanh(pre)
        hs_ref[t] = h_new.astype(hs_ref.dtype)   # store slab; carry stays f32 in vregs
        return h_new

    # T is small and static -> fully unrolled, visible to the LLO scheduler.
    lax.fori_loop(0, T, step, h0_ref[...].astype(jnp.float32), unroll=True)


def rnn_sequence_forward(xs, h0, w_ih, w_hh, b_fused):
    """Run the cell over a whole sequence inside ONE pallas_call (no grid).

    xs: (T, B, I).  Returns hs: (T, B, H); hs[-1] is the final hidden state.
    """
    T, B, I = xs.shape
    H = h0.shape[1]
    # Hoisted input projection + fused bias: one (T*B, I)x(I, H) matmul done once
    # in plain XLA (fuses reshape+matmul+bias); only the W_hh work stays recurrent.
    x_proj = (xs.reshape(T * B, I) @ w_ih.T + b_fused).reshape(T, B, H)
    x_proj = x_proj.astype(jnp.float32)
    return pl.pallas_call(
        rnn_recurrence_kernel,
        out_shape=jax.ShapeDtypeStruct((T, B, H), xs.dtype),
        in_specs=[_full_spec((T, B, H)), _full_spec((B, H)), _full_spec((H, H))],
        out_specs=_full_spec((T, B, H)),
    )(x_proj, h0, w_hh)


def reference_step(x, h, w_ih, w_hh, b_ih, b_hh):
    return jnp.tanh(x @ w_ih.T + b_ih + h @ w_hh.T + b_hh)


if __name__ == "__main__":
    # Module defaults: input_size=4, hidden_size=4, batch_size=1; seq_len=8.
    batch_size, input_size, hidden_size = 1, 4, 4
    seq_len = 8

    key = jax.random.PRNGKey(0)
    k_x, k_wih, k_whh, k_bih, k_bhh = jax.random.split(key, 5)

    # Deterministic PyTorch-style init: uniform(-1/sqrt(H), 1/sqrt(H)).
    bound = 1.0 / (hidden_size ** 0.5)
    w_ih = jax.random.uniform(k_wih, (hidden_size, input_size), jnp.float32, -bound, bound)
    w_hh = jax.random.uniform(k_whh, (hidden_size, hidden_size), jnp.float32, -bound, bound)
    b_ih = jax.random.uniform(k_bih, (hidden_size,), jnp.float32, -bound, bound)
    b_hh = jax.random.uniform(k_bhh, (hidden_size,), jnp.float32, -bound, bound)
    b_fused = prepare_bias(b_ih, b_hh)          # one-time fusion, not per-step work

    xs = jax.random.normal(k_x, (seq_len, batch_size, input_size), jnp.float32)
    h0 = jnp.zeros((batch_size, hidden_size), jnp.float32)   # Model.init_hidden()

    # --- Single step (matches Model.forward exactly) -------------------------
    out = jax.block_until_ready(rnncell_forward(xs[0], h0, w_ih, w_hh, b_fused))
    ref = reference_step(xs[0], h0, w_ih, w_hh, b_ih, b_hh)
    assert out.shape == (batch_size, hidden_size)
    assert jnp.allclose(out, ref, atol=1e-5, rtol=1e-5)

    # --- Whole sequence in ONE pallas_call (unrolled in-kernel recurrence) ---
    hs = jax.block_until_ready(rnn_sequence_forward(xs, h0, w_ih, w_hh, b_fused))
    assert hs.shape == (seq_len, batch_size, hidden_size)
    h_ref = h0
    for t in range(seq_len):
        h_ref = reference_step(xs[t], h_ref, w_ih, w_hh, b_ih, b_hh)
        assert jnp.allclose(hs[t], h_ref, atol=1e-5, rtol=1e-5)

    print("KERNEL_OK")
</pallas_src>

<mosaic_0001>
module attributes {stable_mosaic.version = 11 : i64} {
  func.func @rnncell_step_kernel(%arg0: memref<1x4xf32, #tpu.memory_space<vmem>>, %arg1: memref<1x4xf32, #tpu.memory_space<vmem>>, %arg2: memref<4x4xf32, #tpu.memory_space<vmem>>, %arg3: memref<4x4xf32, #tpu.memory_space<vmem>>, %arg4: memref<1x4xf32, #tpu.memory_space<vmem>>, %arg5: memref<1x4xf32, #tpu.memory_space<vmem>>) attributes {dimension_semantics = [], scalar_prefetch = 0 : i64, scratch_operands = 0 : i64, tpu.core_type = #tpu.core_type<tc>} {
    %c0 = arith.constant 0 : index
    %c0_0 = arith.constant 0 : index
    %0 = vector.load %arg0[%c0, %c0_0] : memref<1x4xf32, #tpu.memory_space<vmem>>, vector<1x4xf32>
    %c0_1 = arith.constant 0 : index
    %c0_2 = arith.constant 0 : index
    %1 = vector.load %arg2[%c0_1, %c0_2] : memref<4x4xf32, #tpu.memory_space<vmem>>, vector<4x4xf32>
    %cst = arith.constant dense<0.000000e+00> : vector<1x4xf32>
    %2 = tpu.matmul %0, %1, %cst {dimension_numbers = #tpu.dot_dimension_numbers<[1], [1], [0], [0], [0, 0, 1, 0], [], []>} : vector<1x4xf32>, vector<4x4xf32>, vector<1x4xf32> -> vector<1x4xf32>
    %c0_3 = arith.constant 0 : index
    %c0_4 = arith.constant 0 : index
    %3 = vector.load %arg1[%c0_3, %c0_4] : memref<1x4xf32, #tpu.memory_space<vmem>>, vector<1x4xf32>
    %c0_5 = arith.constant 0 : index
    %c0_6 = arith.constant 0 : index
    %4 = vector.load %arg3[%c0_5, %c0_6] : memref<4x4xf32, #tpu.memory_space<vmem>>, vector<4x4xf32>
    %cst_7 = arith.constant dense<0.000000e+00> : vector<1x4xf32>
    %5 = tpu.matmul %3, %4, %cst_7 {dimension_numbers = #tpu.dot_dimension_numbers<[1], [1], [0], [0], [0, 0, 1, 0], [], []>} : vector<1x4xf32>, vector<4x4xf32>, vector<1x4xf32> -> vector<1x4xf32>
    %6 = arith.addf %2, %5 : vector<1x4xf32>
    %c0_8 = arith.constant 0 : index
    %c0_9 = arith.constant 0 : index
    %7 = vector.load %arg4[%c0_8, %c0_9] : memref<1x4xf32, #tpu.memory_space<vmem>>, vector<1x4xf32>
    %8 = arith.addf %6, %7 : vector<1x4xf32>
    %9 = math.tanh %8 : vector<1x4xf32>
    %c0_10 = arith.constant 0 : index
    %c0_11 = arith.constant 0 : index
    %10 = vector.load %arg5[%c0_10, %c0_11] : memref<1x4xf32, #tpu.memory_space<vmem>>, vector<1x4xf32>
    tpu.vector_store %arg5[%c0_10, %c0_11], %9 {strides = array<i32>} : memref<1x4xf32, #tpu.memory_space<vmem>>, vector<1x4xf32>,
    return
  }
}

</mosaic_0001>

<bundles_post_ra>
// kernel: tpu_custom_call.1
= control target key start
LH: loop header
LB: loop body
LE: loop exit
PB: predicated region body
PF: predicated region fallthrough
CT: control target
= control target key end

     0   :  { %10 = vsyncpa [#allocation3], 0  ;;  %s352_s0 = inlined_call_operand.hbm [shape: f32[1,4], index: 0, kind: input, shape index: {}]   ;;  %s353_s1 = inlined_call_operand.vmem [shape: f32[1,4], index: 1, kind: input, shape index: {}]   ;;  %s354_s2 = inlined_call_operand.vmem [shape: f32[4,4], index: 2, kind: input, shape index: {}]   ;;  %s355_s3 = inlined_call_operand.vmem [shape: f32[4,4], index: 3, kind: input, shape index: {}]   ;;  %s356_s4 = inlined_call_operand.vmem [shape: f32[1,4], index: 4, kind: input, shape index: {}]   ;;  %s357_s5 = inlined_call_operand.hbm [shape: f32[1,4], index: 5, kind: output, shape index: {}]  }
   0x1   :  { %11 = vsyncpa [#allocation4], 0  ;;  %s282_s18 = smov [#allocation2]   ;;  %s234_s22 = scalar_lea.hbm %s352_s0, 16 }
   0x2   :  { %s18_s19 = sshll.u32 %s282_s18, 4  ;;  %p235_p0 = scmp.ne.s32.totalorder %s352_s0, %s234_s22  ;;  %s19_s19 = int_to_ptr.vmem [resolvable:$true] %s18_s19 }
   0x3   :  { %p238_p1 = scmp.lt.u32.totalorder %s234_s22, %s352_s0 }
   0x5   :  { %p240_p2 = pnand %p238_p1, %p235_p0 }
   0x7   :  { %243 = shalt.err (!%p240_p2)
}
   0x8   :  { %s244_s27 = scalar_lea.vmem %s19_s19, 16  ;;  %s248_s28 = scalar_lea.vmem %s19_s19, 32 }
   0x9   :  { %p245_p3 = scmp.ne.s32.totalorder %s19_s19, %s244_s27  ;;  %p249_p4 = scmp.lt.s32.totalorder %s19_s19, %s19_s19 }
   0xa   :  { %p250_p5 = scmp.lt.s32.totalorder %s248_s28, %s244_s27 }
   0xc   :  { %p251_p6 = por %p250_p5, %p249_p4 }
   0xe   :  { %p252_p7 = pnand %p251_p6, %p245_p3 }
  0x10   :  { %255 = shalt.err (!%p252_p7)
}
  0x11   :  { %21 = dma.hbm_to_vmem [thread:$0]  %s352_s0, 16, %s19_s19, [#allocation3]  }
  0x12   :  { %278 = dma.done.wait [#allocation3], 16  }
  0x13   :  { %279 = vsyncadd [#allocation3], 4294967280  ;;  %v283_v0 = vmov 0.0   ;;  %vm284_vm0 = vmmov 0   ;;  %vm37_vm1 = vcmask 31744   ;;  %vm193_vm2 = vcmask 24576  }
  0x14   :  { %218 = vmatprep.subr.mxu0 %v283_v0  ;;  %223 = vmatprep.subr.mxu1 %v283_v0  ;;  %v36_v1 = vld [vmem:[%s355_s3] sm:$0xf]  ;;  %v33_v4 = vld [vmem:[#allocation2] sm:$0x1] }
  0x15   :  { %220 = vmatprep.mubr.msk.f32.mxu0 %vm284_vm0, %v283_v0  ;;  %225 = vmatprep.mubr.msk.f32.mxu1 %vm284_vm0, %v283_v0  ;;  %v34_v2 = vld [vmem:[%s354_s2] sm:$0xf]  ;;  %s285_s2 = smov [#allocation5]  }
  0x16   :  { %219 = vmatpush3.xpose.msk.msra.mxu0 %vm37_vm1, %v36_v1  ;;  %224 = vmatpush3.xpose.msk.msra.mxu1 %vm37_vm1, %v34_v2  ;;  %v35_v3 = vld [vmem:[%s353_s1] sm:$0x1]  ;;  %s201_s3 = sshll.u32 %s285_s2, 4  ;;  %s202_s3 = int_to_ptr.vmem [resolvable:$true] %s201_s3 }
  0x17   :  { %v190_v7 = vld [vmem:[%s356_s4] sm:$0x1]  ;;  %s256_s1 = scalar_lea.vmem %s202_s3, 16  ;;  %s260_s13 = scalar_lea.vmem %s202_s3, 32 }
  0x18   :  { %p257_p8 = scmp.ne.s32.totalorder %s202_s3, %s256_s1  ;;  %p261_p9 = scmp.lt.s32.totalorder %s202_s3, %s202_s3 }
  0x19   :  { %221 = vmatmul.mubr.msk.f32.vlgmr.msra.gmra.mrb[0].mxu0 %vm37_vm1, %v35_v3  ;;  %226 = vmatmul.mubr.msk.f32.vlgmr.msra.gmra.mrb[0].mxu1 %vm37_vm1, %v33_v4  ;;  %p262_p10 = scmp.lt.s32.totalorder %s260_s13, %s256_s1 }
  0x1b   :  { %p263_p11 = por %p262_p10, %p261_p9 }
  0x1d   :  { %p264_p12 = pnand %p263_p11, %p257_p8 }
  0xec   :  { %v110_v5 = vpop.f32.mrb[0].mxu0  ;;  %v186_v6 = vpop.f32.mrb[0].mxu1 }
  0xed   :  { %v187_v8 = vadd.f32 %v186_v6, %v110_v5  ;;  %v222_v9 = vpop.f32.mrb[1].mxu0  ;;  %v227_v10 = vpop.f32.mrb[1].mxu1 }
  0xef   :  { %v191_v11 = vadd.f32 %v190_v7, %v187_v8 }
  0xf1   :  { %232 = vtanh.f32 %v191_v11 }
  0xfb   :  { %v233_v12 = vpop.eup %232 }
  0xfc   :  { %194 = vst.msk [vmem:[#allocation5] sm:$0x1] %vm193_vm2, %v233_v12 }
  0xfd   :  { %267 = shalt.err (!%p264_p12)
}
  0xfe   :  { %s268_s15 = scalar_lea.hbm %s357_s5, 16 }
  0xff   :  { %p269_p13 = scmp.ne.s32.totalorder %s357_s5, %s268_s15  ;;  %p272_p0 = scmp.lt.u32.totalorder %s268_s15, %s357_s5 }
 0x101   :  { %p274_p1 = pnand %p272_p0, %p269_p13 }
 0x103   :  { %277 = shalt.err (!%p274_p1)
}
 0x104   :  { %204 = dma.vmem_to_hbm [thread:$0]  %s202_s3, 16, %s357_s5, [#allocation4]  }
 0x105   :  { %280 = dma.done.wait [#allocation4], 16  }
 0x106   :  { %281 = vsyncadd [#allocation4], 4294967280 }
 0x107   :  { %208 = vsyncpa [#allocation3], 1 }
 0x108   :  { %209 = vsyncpa [#allocation4], 1 }

</bundles_post_ra>
